<compile_context>
chip_gen: v7x
topology: tpu7x:2x2x1
jax: 0.10.0
libtpu: 0.0.40
codegen_flags: <defaults>
</compile_context>

<pallas_src>
import jax
import jax.numpy as jnp
from jax.experimental import pallas as pl
from jax.experimental.pallas import tpu as pltpu

LANE = 128
SUBLANE = 8
TR_MAX = 4096  # 128-lane rows per block: x block = F*tr*128*4 B = 4 MiB for F=2


def _linear_sigmoid_kernel(x_ref, w_ref, b_ref, o_ref):
    # x_ref: (F, tr, 128) f32 in VMEM  (batch packed on sublanes + lanes)
    # w_ref: (F,)         f32 in SMEM  (scalar reads)
    # b_ref: (1,)         f32 in SMEM
    # o_ref: (tr, 128)    f32 in VMEM
    F = x_ref.shape[0]
    z = x_ref[0] * w_ref[0] + b_ref[0]          # (tr, 128) VPU FMA
    for f in range(1, F):                       # static unroll (F == 2)
        z = z + x_ref[f] * w_ref[f]
    # sigmoid(z) = 0.5 * (tanh(z/2) + 1): one EUP op, robust for large |z|
    o_ref[...] = 0.5 * (jnp.tanh(0.5 * z) + 1.0)


def _pick_tr(num_rows: int) -> int:
    """Rows (of 128 lanes) per block: multiple of 8 (or the full extent),
    aim for >= ~8 grid steps when possible (v7x has 2 TensorCores), capped at
    TR_MAX so the double-buffered VMEM footprint (~3 KiB/row) stays ~12 MiB."""
    if num_rows <= SUBLANE:
        return num_rows                          # single full-extent block
    tr = -(-num_rows // SUBLANE)                 # cdiv: ~8 grid steps
    tr = -(-tr // SUBLANE) * SUBLANE             # round up to sublane tile
    return min(TR_MAX, tr)


def binary_classification_forward(x, w, b):
    """x: (B, in) f32, w: (out=1, in) f32, b: (out=1,) f32 -> (B, 1) f32."""
    B, F = x.shape
    assert w.shape == (1, F), "kernel assumes out_features == 1"
    assert b.shape == (1,)

    # Pack batch onto (sublane, lane): (B, F) -> (F, R, 128).
    # cast + pad + transpose + reshape fuse into a single XLA copy.
    R = pl.cdiv(B, LANE)
    Bp = R * LANE
    xp = x.astype(jnp.float32)
    if Bp != B:
        xp = jnp.pad(xp, ((0, Bp - B), (0, 0)))
    x3 = xp.T.reshape(F, R, LANE)

    tr = _pick_tr(R)
    grid = (pl.cdiv(R, tr),)

    out = pl.pallas_call(
        _linear_sigmoid_kernel,
        out_shape=jax.ShapeDtypeStruct((R, LANE), jnp.float32),
        grid=grid,
        in_specs=[
            pl.BlockSpec((F, tr, LANE), lambda i: (0, i, 0)),     # x tile (VMEM)
            pl.BlockSpec(memory_space=pltpu.MemorySpace.SMEM),    # w scalars
            pl.BlockSpec(memory_space=pltpu.MemorySpace.SMEM),    # b scalar
        ],
        out_specs=pl.BlockSpec((tr, LANE), lambda i: (i, 0)),
        compiler_params=pltpu.CompilerParams(
            dimension_semantics=("parallel",),
            vmem_limit_bytes=32 * 1024 * 1024,
        ),
    )(x3, w.reshape(F).astype(jnp.float32), b.astype(jnp.float32))

    # Free metadata reshape when B % 128 == 0; tiny tail slice otherwise.
    return out.reshape(Bp)[:B].reshape(B, 1)


if __name__ == "__main__":
    key = jax.random.PRNGKey(0)
    k_x, k_w, k_b, k_x2 = jax.random.split(key, 4)

    in_features, out_features = 2, 1

    # nn.Linear-style init: uniform(-1/sqrt(in), 1/sqrt(in))
    bound = 1.0 / (in_features ** 0.5)
    w = jax.random.uniform(k_w, (out_features, in_features),
                           minval=-bound, maxval=bound, dtype=jnp.float32)
    b = jax.random.uniform(k_b, (out_features,),
                           minval=-bound, maxval=bound, dtype=jnp.float32)

    # Small shape matching the module's intended use (single block path).
    batch = 8
    x = jax.random.normal(k_x, (batch, in_features), dtype=jnp.float32)
    out = jax.block_until_ready(binary_classification_forward(x, w, b))
    ref = jax.nn.sigmoid(x @ w.T + b)
    assert out.shape == (batch, out_features)
    assert jnp.allclose(out, ref, atol=1e-5), "mismatch vs. reference (B=8)"

    # Multi-step grid with a partial last block and a non-128-multiple batch.
    batch2 = 4500
    x2 = jax.random.normal(k_x2, (batch2, in_features), dtype=jnp.float32)
    out2 = jax.block_until_ready(binary_classification_forward(x2, w, b))
    ref2 = jax.nn.sigmoid(x2 @ w.T + b)
    assert out2.shape == (batch2, out_features)
    assert jnp.allclose(out2, ref2, atol=1e-5), "mismatch vs. reference (B=4500)"

    print("KERNEL_OK")
</pallas_src>

<mosaic_0001>
module attributes {stable_mosaic.version = 11 : i64} {
  func.func @_linear_sigmoid_kernel(%arg0: i32, %arg1: memref<2x1x128xf32, #tpu.memory_space<vmem>>, %arg2: memref<2xf32, #tpu.memory_space<smem>>, %arg3: memref<1xf32, #tpu.memory_space<smem>>, %arg4: memref<1x128xf32, #tpu.memory_space<vmem>>) attributes {dimension_semantics = [#tpu.dimension_semantics<parallel>], iteration_bounds = array<i64: 1>, scalar_prefetch = 0 : i64, scratch_operands = 0 : i64, tpu.core_type = #tpu.core_type<tc>, window_params = [{transform_indices = @transform_0, window_bounds = array<i64: 2, 1, 128>}, {transform_indices = @transform_1, window_bounds = array<i64: 2>}, {transform_indices = @transform_2, window_bounds = array<i64: 1>}, {transform_indices = @transform_3, window_bounds = array<i64: 1, 128>}]} {
    %c0 = arith.constant 0 : index
    %c0_0 = arith.constant 0 : index
    %c0_1 = arith.constant 0 : index
    %0 = vector.load %arg1[%c0, %c0_0, %c0_1] : memref<2x1x128xf32, #tpu.memory_space<vmem>>, vector<1x1x128xf32>
    %1 = vector.shape_cast %0 : vector<1x1x128xf32> to vector<1x128xf32>
    %c0_2 = arith.constant 0 : index
    %2 = memref.load %arg2[%c0_2] : memref<2xf32, #tpu.memory_space<smem>>
    %3 = vector.broadcast %2 : f32 to vector<1x128xf32>
    %4 = arith.mulf %1, %3 : vector<1x128xf32>
    %c0_3 = arith.constant 0 : index
    %5 = memref.load %arg3[%c0_3] : memref<1xf32, #tpu.memory_space<smem>>
    %6 = vector.broadcast %5 : f32 to vector<1x128xf32>
    %7 = arith.addf %4, %6 : vector<1x128xf32>
    %c1 = arith.constant 1 : index
    %c0_4 = arith.constant 0 : index
    %c0_5 = arith.constant 0 : index
    %8 = vector.load %arg1[%c1, %c0_4, %c0_5] : memref<2x1x128xf32, #tpu.memory_space<vmem>>, vector<1x1x128xf32>
    %9 = vector.shape_cast %8 : vector<1x1x128xf32> to vector<1x128xf32>
    %c1_6 = arith.constant 1 : index
    %10 = memref.load %arg2[%c1_6] : memref<2xf32, #tpu.memory_space<smem>>
    %11 = vector.broadcast %10 : f32 to vector<1x128xf32>
    %12 = arith.mulf %9, %11 : vector<1x128xf32>
    %13 = arith.addf %7, %12 : vector<1x128xf32>
    %cst = arith.constant 5.000000e-01 : f32
    %14 = vector.broadcast %cst : f32 to vector<1x128xf32>
    %15 = arith.mulf %14, %13 : vector<1x128xf32>
    %16 = math.tanh %15 : vector<1x128xf32>
    %cst_7 = arith.constant 1.000000e+00 : f32
    %17 = vector.broadcast %cst_7 : f32 to vector<1x128xf32>
    %18 = arith.addf %16, %17 : vector<1x128xf32>
    %cst_8 = arith.constant 5.000000e-01 : f32
    %19 = vector.broadcast %cst_8 : f32 to vector<1x128xf32>
    %20 = arith.mulf %19, %18 : vector<1x128xf32>
    %c0_9 = arith.constant 0 : index
    %c0_10 = arith.constant 0 : index
    %21 = vector.load %arg4[%c0_9, %c0_10] : memref<1x128xf32, #tpu.memory_space<vmem>>, vector<1x128xf32>
    tpu.vector_store %arg4[%c0_9, %c0_10], %20 {strides = array<i32>} : memref<1x128xf32, #tpu.memory_space<vmem>>, vector<1x128xf32>,
    return
  }
  func.func @transform_0(%arg0: i32) -> (i32, i32, i32) {
    %c0_i32 = arith.constant 0 : i32
    %c0_i32_0 = arith.constant 0 : i32
    %c0_i32_1 = arith.constant 0 : i32
    return %c0_i32, %arg0, %c0_i32_0 : i32, i32, i32
  }
  func.func @transform_1(%arg0: i32) -> i32 {
    %c0_i32 = arith.constant 0 : i32
    %c0_i32_0 = arith.constant 0 : i32
    return %c0_i32 : i32
  }
  func.func @transform_2(%arg0: i32) -> i32 {
    %c0_i32 = arith.constant 0 : i32
    %c0_i32_0 = arith.constant 0 : i32
    return %c0_i32 : i32
  }
  func.func @transform_3(%arg0: i32) -> (i32, i32) {
    %c0_i32 = arith.constant 0 : i32
    %c0_i32_0 = arith.constant 0 : i32
    return %arg0, %c0_i32 : i32, i32
  }
}

</mosaic_0001>

<bundles_post_ra>
// kernel: tpu_custom_call.1
= control target key start
LH: loop header
LB: loop body
LE: loop exit
PB: predicated region body
PF: predicated region fallthrough
CT: control target
= control target key end

     0   :  { %9 = vsyncpa [#allocation5], 0  ;;  %s152_s0 = inlined_call_operand.vmem [shape: f32[2,1,128], index: 0, kind: input, shape index: {}]   ;;  %s153_s1 = inlined_call_operand.vmem [shape: f32[2], index: 1, kind: input, shape index: {}]   ;;  %s154_s2 = inlined_call_operand.<no memory space> [shape: f32[1], index: 2, kind: input, shape index: {}]   ;;  %s155_s3 = inlined_call_operand.hbm [shape: f32[1,128], index: 3, kind: output, shape index: {}]  }
   0x1   :  { %10 = vsyncpa [#allocation4], 0  ;;  %s19_s14 = sshll.u32 %s153_s1, 4  ;;  %s20_s14 = int_to_ptr.vmem [resolvable:$true] %s19_s14 }
   0x2   :  { %s68_s15 = scalar_lea.vmem %s20_s14, 16  ;;  %p73_p1 = scmp.lt.s32.totalorder %s20_s14, %s20_s14 }
   0x3   :  { %p69_p0 = scmp.ne.s32.totalorder %s20_s14, %s68_s15  ;;  %p74_p2 = scmp.lt.s32.totalorder %s68_s15, %s68_s15 }
   0x5   :  { %p75_p3 = por %p74_p2, %p73_p1 }
   0x7   :  { %p76_p4 = pnand %p75_p3, %p69_p0 }
   0x9   :  { %79 = shalt.err (!%p76_p4)
}
   0xa   :  { %s106_s16 = smov [#allocation3]  }
   0xb   :  { %22 = dma.vmem_to_smem %s20_s14, 16, %s106_s16, [#allocation5]  }
   0xc   :  { %102 = dma.done.wait [#allocation5], 16  }
   0xd   :  { %103 = vsyncadd [#allocation5], 4294967280 }
   0xe   :  { %28 = sfence }
   0xf   :  { %s30_s17 = sld [smem:[#allocation3]]  ;;  %s63_s18 = sld [smem:[#allocation3 + $0x1]]  ;;  %v29_v0 = vld [vmem:[%s152_s0] sm:$0x1]  ;;  %v62_v1 = vld [vmem:[%s152_s0 + $0x1] sm:$0x1]  ;;  %v34_v3 = vstv %s154_s2 }
  0x10   :  { %s107_s24 = smov [#allocation6]  }
  0x11   :  { %s53_s25 = sshll.u32 %s107_s24, 4  ;;  %s54_s25 = int_to_ptr.vmem [resolvable:$true] %s53_s25 }
  0x12   :  { %s80_s0 = scalar_lea.vmem %s54_s25, 16  ;;  %s84_s26 = scalar_lea.vmem %s54_s25, 32 }
  0x13   :  { %p81_p5 = scmp.ne.s32.totalorder %s54_s25, %s80_s0  ;;  %p85_p6 = scmp.lt.s32.totalorder %s54_s25, %s54_s25 }
  0x14   :  { %p86_p7 = scmp.lt.s32.totalorder %s84_s26, %s80_s0 }
  0x15   :  { %v31_v2 = vstv %s30_s17  ;;  %v39_v5 = vstv %s63_s18 }
  0x16   :  { %v32_v4 = vmul.f32 %v31_v2, %v29_v0  ;;  %v40_v6 = vmul.f32 %v62_v1, %v39_v5  ;;  %p87_p8 = por %p86_p7, %p85_p6 }
  0x18   :  { %v35_v7 = vadd.f32 %v34_v3, %v32_v4  ;;  %p88_p9 = pnand %p87_p8, %p81_p5 }
  0x1a   :  { %v41_v8 = vadd.f32 %v40_v6, %v35_v7 }
  0x1c   :  { %v42_v9 = vmul.f32 0.5, %v41_v8 }
  0x1e   :  { %66 = vtanh.f32 %v42_v9 }
  0x28   :  { %v67_v10 = vpop.eup %66 }
  0x29   :  { %v44_v11 = vadd.f32 1.0, %v67_v10 }
  0x2b   :  { %v45_v12 = vmul.f32 0.5, %v44_v11 }
  0x2d   :  { %46 = vst [vmem:[#allocation6] sm:$0x1] %v45_v12 }
  0x2e   :  { %91 = shalt.err (!%p88_p9)
}
  0x2f   :  { %s92_s28 = scalar_lea.hbm %s155_s3, 16 }
  0x30   :  { %p93_p10 = scmp.ne.s32.totalorder %s155_s3, %s92_s28  ;;  %p96_p11 = scmp.lt.u32.totalorder %s92_s28, %s155_s3 }
  0x32   :  { %p98_p12 = pnand %p96_p11, %p93_p10 }
  0x34   :  { %101 = shalt.err (!%p98_p12)
}
  0x35   :  { %56 = dma.vmem_to_hbm [thread:$0]  %s54_s25, 16, %s155_s3, [#allocation4]  }
  0x36   :  { %104 = dma.done.wait [#allocation4], 16  }
  0x37   :  { %105 = vsyncadd [#allocation4], 4294967280 }
  0x38   :  { %60 = vsyncpa [#allocation4], 1 }
  0x39   :  { %61 = vsyncpa [#allocation5], 1 }

</bundles_post_ra>
